<compile_context>
chip_gen: v5e
topology: v5e:2x2
jax: 0.10.0
libtpu: 0.0.40
codegen_flags: <defaults>
</compile_context>

<pallas_src>
import functools

import jax
import jax.numpy as jnp
from jax.experimental import pallas as pl
from jax.experimental.pallas import tpu as pltpu


def _round_up(v, m):
    return (v + m - 1) // m * m


_VMEM_LIMIT = 48 * 1024 * 1024   # safe on v5e/v6e (128 MiB) and v7x (64 MiB)
_MAX_TK = 2048                   # largest K in this net is 1792 (padded)
_NEG = jnp.float32(-1e30)


# ----------------------------------------------------------------------------
# Pallas kernel 1a: fused matmul + bias (+ optional ReLU), full-K in one tile.
# bf16 operands on the MXU, f32 accumulate and epilogue.
# ----------------------------------------------------------------------------
def _mm_kernel(x_ref, w_ref, b_ref, o_ref, *, relu):
    acc = jnp.dot(x_ref[...], w_ref[...], preferred_element_type=jnp.float32)
    r = acc + b_ref[...]
    if relu:
        r = jnp.maximum(r, 0.0)
    o_ref[...] = r.astype(o_ref.dtype)


# ----------------------------------------------------------------------------
# Pallas kernel 1b: K-split fallback with f32 VMEM accumulator.  Only taken
# when K is too large for a single tile (never hit by this network's shapes).
# ----------------------------------------------------------------------------
def _mm_kernel_ksplit(x_ref, w_ref, b_ref, o_ref, acc_ref, *, relu):
    k = pl.program_id(2)

    @pl.when(k == 0)
    def _():
        acc_ref[...] = jnp.zeros_like(acc_ref)

    acc_ref[...] += jnp.dot(x_ref[...], w_ref[...],
                            preferred_element_type=jnp.float32)

    @pl.when(k == pl.num_programs(2) - 1)
    def _():
        r = acc_ref[...] + b_ref[...]
        if relu:
            r = jnp.maximum(r, 0.0)
        o_ref[...] = r.astype(o_ref.dtype)


@functools.partial(jax.jit, static_argnames=("relu",))
def matmul_bias_act(x, w, b, relu):
    """x: [M, K], w: [K, N], b: [N] -> [M, N] f32 (bf16 MXU, f32 accumulate)."""
    M, K = x.shape
    _, N = w.shape
    x = x.astype(jnp.bfloat16)
    w = w.astype(jnp.bfloat16)
    b = b.astype(jnp.float32)

    # bf16 packs two rows per sublane -> keep M tile a multiple of 16.
    tm = 256 if M > 512 else _round_up(M, 16)
    tn = 256 if N > 512 else _round_up(N, 128)
    Mp, Np = _round_up(M, tm), _round_up(N, tn)
    Kp = _round_up(K, 128)

    bp = jnp.pad(b, (0, Np - N)).reshape(1, Np)

    if Kp <= _MAX_TK:
        # Single K tile: no reduction grid axis, no accumulator revisit.
        xp = jnp.pad(x, ((0, Mp - M), (0, Kp - K)))
        wp = jnp.pad(w, ((0, Kp - K), (0, Np - N)))
        out = pl.pallas_call(
            functools.partial(_mm_kernel, relu=relu),
            out_shape=jax.ShapeDtypeStruct((Mp, Np), jnp.float32),
            grid_spec=pltpu.PrefetchScalarGridSpec(
                num_scalar_prefetch=0,
                grid=(Mp // tm, Np // tn),
                in_specs=[
                    pl.BlockSpec((tm, Kp), lambda i, j: (i, 0)),
                    pl.BlockSpec((Kp, tn), lambda i, j: (0, j)),
                    pl.BlockSpec((1, tn), lambda i, j: (0, j)),
                ],
                out_specs=pl.BlockSpec((tm, tn), lambda i, j: (i, j)),
            ),
            compiler_params=pltpu.CompilerParams(
                dimension_semantics=("parallel", "parallel"),
                vmem_limit_bytes=_VMEM_LIMIT),
        )(xp, wp, bp)
    else:
        tk = _MAX_TK
        Kp = _round_up(K, tk)
        xp = jnp.pad(x, ((0, Mp - M), (0, Kp - K)))
        wp = jnp.pad(w, ((0, Kp - K), (0, Np - N)))
        out = pl.pallas_call(
            functools.partial(_mm_kernel_ksplit, relu=relu),
            out_shape=jax.ShapeDtypeStruct((Mp, Np), jnp.float32),
            grid_spec=pltpu.PrefetchScalarGridSpec(
                num_scalar_prefetch=0,
                grid=(Mp // tm, Np // tn, Kp // tk),
                in_specs=[
                    pl.BlockSpec((tm, tk), lambda i, j, k: (i, k)),
                    pl.BlockSpec((tk, tn), lambda i, j, k: (k, j)),
                    pl.BlockSpec((1, tn), lambda i, j, k: (0, j)),
                ],
                out_specs=pl.BlockSpec((tm, tn), lambda i, j, k: (i, j)),
                scratch_shapes=[pltpu.VMEM((tm, tn), jnp.float32)],
            ),
            compiler_params=pltpu.CompilerParams(
                dimension_semantics=("parallel", "parallel", "arbitrary"),
                vmem_limit_bytes=_VMEM_LIMIT),
        )(xp, wp, bp)
    return out[:M, :N]


# ----------------------------------------------------------------------------
# Pallas kernel 2: 3x3 max-pool.  The 9 shifted window views are stacked on
# the LEADING axis so the reduction is a chain of cheap VPU elementwise maxes
# over well-tiled (tm, Cp) planes.
# ----------------------------------------------------------------------------
def _maxpool_kernel(x_ref, o_ref):
    r = x_ref[0]
    for t in range(1, x_ref.shape[0]):
        r = jnp.maximum(r, x_ref[t])
    o_ref[...] = r


@functools.partial(jax.jit, static_argnames=("stride",))
def maxpool2d_3x3(x, stride):
    """PyTorch MaxPool2d(kernel_size=3, stride=stride, padding=1) on NHWC."""
    N, H, W, C = x.shape
    k, pad = 3, 1
    Ho = (H + 2 * pad - k) // stride + 1
    Wo = (W + 2 * pad - k) // stride + 1
    xp = jnp.pad(x, ((0, 0), (pad, pad), (pad, pad), (0, 0)),
                 constant_values=_NEG)
    views = []
    for i in range(k):
        for j in range(k):
            views.append(xp[:, i:i + (Ho - 1) * stride + 1:stride,
                            j:j + (Wo - 1) * stride + 1:stride, :])
    # (9, M, C): window axis leading, lanes stay dense on C.
    stacked = jnp.stack(views, axis=0).reshape(k * k, N * Ho * Wo, C)

    M = N * Ho * Wo
    tm = 256 if M >= 256 else _round_up(M, 8)
    Mp = _round_up(M, tm)
    Cp = _round_up(C, 128)
    sp = jnp.pad(stacked, ((0, 0), (0, Mp - M), (0, Cp - C)),
                 constant_values=_NEG)

    out = pl.pallas_call(
        _maxpool_kernel,
        out_shape=jax.ShapeDtypeStruct((Mp, Cp), x.dtype),
        grid_spec=pltpu.PrefetchScalarGridSpec(
            num_scalar_prefetch=0,
            grid=(Mp // tm,),
            in_specs=[pl.BlockSpec((k * k, tm, Cp), lambda i: (0, i, 0))],
            out_specs=pl.BlockSpec((tm, Cp), lambda i: (i, 0)),
        ),
        compiler_params=pltpu.CompilerParams(
            dimension_semantics=("parallel",),
            vmem_limit_bytes=_VMEM_LIMIT),
    )(sp)
    return out[:M, :C].reshape(N, Ho, Wo, C)


# ----------------------------------------------------------------------------
# Pallas kernel 3: global average pool (AdaptiveAvgPool2d((1,1)) + Flatten),
# tiled over channels with a "parallel" grid (megacore-friendly on v7x).
# ----------------------------------------------------------------------------
def _avgpool_kernel(x_ref, o_ref):
    o_ref[...] = jnp.mean(x_ref[...], axis=1)


@jax.jit
def global_avgpool(x):
    N, H, W, C = x.shape
    tc = 256
    Cp = _round_up(C, tc)
    xr = jnp.pad(x.reshape(N, H * W, C), ((0, 0), (0, 0), (0, Cp - C)))
    out = pl.pallas_call(
        _avgpool_kernel,
        out_shape=jax.ShapeDtypeStruct((N, Cp), x.dtype),
        grid_spec=pltpu.PrefetchScalarGridSpec(
            num_scalar_prefetch=0,
            grid=(Cp // tc,),
            in_specs=[pl.BlockSpec((N, H * W, tc), lambda i: (0, 0, i))],
            out_specs=pl.BlockSpec((N, tc), lambda i: (0, i)),
        ),
        compiler_params=pltpu.CompilerParams(
            dimension_semantics=("parallel",),
            vmem_limit_bytes=_VMEM_LIMIT),
    )(xr)
    return out[:, :C]


# ----------------------------------------------------------------------------
# Convolution = (optional) im2col glue + Pallas matmul kernel.
# ----------------------------------------------------------------------------
def _im2col(x, kh, kw, stride, pad):
    N, H, W, C = x.shape
    Ho = (H + 2 * pad - kh) // stride + 1
    Wo = (W + 2 * pad - kw) // stride + 1
    if kh == 1 and kw == 1 and stride == 1 and pad == 0:
        # 1x1 conv: no patch materialization, pure reshape.
        return x.reshape(N * H * W, C), (N, Ho, Wo)
    xp = jnp.pad(x, ((0, 0), (pad, pad), (pad, pad), (0, 0)))
    views = []
    for i in range(kh):
        for j in range(kw):
            views.append(xp[:, i:i + (Ho - 1) * stride + 1:stride,
                            j:j + (Wo - 1) * stride + 1:stride, :])
    cols = jnp.stack(views, axis=3)  # [N, Ho, Wo, kh*kw, C]
    return cols.reshape(N * Ho * Wo, kh * kw * C), (N, Ho, Wo)


def conv2d(x, p, stride=1, pad=0, relu=True):
    """x: NHWC, p['w']: [kh, kw, Cin, Cout], p['b']: [Cout]."""
    kh, kw, cin, cout = p["w"].shape
    # Cast activations to bf16 BEFORE im2col so the kh*kw-inflated patch
    # array carries half the HBM bytes.  Accumulation stays f32 in-kernel.
    cols, (N, Ho, Wo) = _im2col(x.astype(jnp.bfloat16), kh, kw, stride, pad)
    w2 = p["w"].reshape(kh * kw * cin, cout)
    out = matmul_bias_act(cols, w2, p["b"], relu)
    return out.reshape(N, Ho, Wo, cout)


# ----------------------------------------------------------------------------
# Parameters (deterministic, He-style init).
# ----------------------------------------------------------------------------
def make_params(seed=0):
    key = jax.random.PRNGKey(seed)
    keys = iter(jax.random.split(key, 256))

    def conv_p(cin, cout, k):
        fan_in = cin * k * k
        w = jax.random.normal(next(keys), (k, k, cin, cout),
                              jnp.float32) * (2.0 / fan_in) ** 0.5
        b = jnp.zeros((cout,), jnp.float32)
        return {"w": w, "b": b}

    def incep_p(cin, c1, c2, c3, c4):
        return {
            "p1_1": conv_p(cin, c1, 1),
            "p2_1": conv_p(cin, c2[0], 1),
            "p2_2": conv_p(c2[0], c2[1], 3),
            "p3_1": conv_p(cin, c3[0], 1),
            "p3_2": conv_p(c3[0], c3[1], 5),
            "p4_2": conv_p(cin, c4, 1),
        }

    params = {
        "b1_conv": conv_p(1, 64, 7),
        "b2_conv1": conv_p(64, 64, 1),
        "b2_conv2": conv_p(64, 192, 3),
        "b3_i1": incep_p(192, 64, (96, 128), (16, 32), 32),
        "b3_i2": incep_p(256, 128, (128, 192), (32, 96), 64),
        "b4_i1": incep_p(480, 192, (96, 208), (16, 48), 64),
        "b4_i2": incep_p(512, 160, (112, 224), (24, 64), 64),
        "b4_i3": incep_p(512, 128, (128, 256), (24, 64), 64),
        "b4_i4": incep_p(512, 112, (144, 288), (32, 64), 64),
        "b4_i5": incep_p(528, 256, (160, 320), (32, 128), 128),
        "b5_i1": incep_p(832, 256, (160, 320), (32, 128), 128),
        "b5_i2": incep_p(832, 384, (192, 384), (48, 128), 128),
        "fc": {
            "w": jax.random.normal(next(keys), (1024, 10),
                                   jnp.float32) * (1.0 / 1024.0) ** 0.5,
            "b": jnp.zeros((10,), jnp.float32),
        },
    }
    return params


# ----------------------------------------------------------------------------
# Forward pass (matches torch GoogLeNet semantics).
# ----------------------------------------------------------------------------
def inception_fwd(x, p):
    p1 = conv2d(x, p["p1_1"], relu=True)
    p2 = conv2d(conv2d(x, p["p2_1"], relu=True), p["p2_2"], pad=1, relu=True)
    p3 = conv2d(conv2d(x, p["p3_1"], relu=True), p["p3_2"], pad=2, relu=True)
    p4 = conv2d(maxpool2d_3x3(x, stride=1), p["p4_2"], relu=True)
    # torch.cat(dim=1) on NCHW == concat on channel == last axis in NHWC
    return jnp.concatenate([p1, p2, p3, p4], axis=-1)


def googlenet_fwd(x_nchw, params):
    x = jnp.transpose(x_nchw, (0, 2, 3, 1))  # NCHW -> NHWC
    # b1
    x = conv2d(x, params["b1_conv"], stride=2, pad=3, relu=True)
    x = maxpool2d_3x3(x, stride=2)
    # b2
    x = conv2d(x, params["b2_conv1"], relu=True)
    x = conv2d(x, params["b2_conv2"], pad=1, relu=True)
    x = maxpool2d_3x3(x, stride=2)
    # b3
    x = inception_fwd(x, params["b3_i1"])
    x = inception_fwd(x, params["b3_i2"])
    x = maxpool2d_3x3(x, stride=2)
    # b4
    for name in ("b4_i1", "b4_i2", "b4_i3", "b4_i4", "b4_i5"):
        x = inception_fwd(x, params[name])
    x = maxpool2d_3x3(x, stride=2)
    # b5
    x = inception_fwd(x, params["b5_i1"])
    x = inception_fwd(x, params["b5_i2"])
    x = global_avgpool(x)  # AdaptiveAvgPool2d((1,1)) + Flatten -> [N, 1024]
    # final Linear(1024, 10)
    logits = matmul_bias_act(x, params["fc"]["w"], params["fc"]["b"],
                             relu=False)
    return logits


if __name__ == "__main__":
    key = jax.random.PRNGKey(0)
    # Small input consistent with the module (original uses (1, 1, 96, 96));
    # AdaptiveAvgPool2d makes the net shape-flexible, so use 32x32 for speed.
    x = jax.random.normal(key, (2, 1, 32, 32), jnp.float32)  # NCHW
    params = make_params(0)
    out = googlenet_fwd(x, params)
    out = jax.block_until_ready(out)
    assert out.shape == (2, 10), out.shape
    assert bool(jnp.all(jnp.isfinite(out)))
    print("KERNEL_OK")
</pallas_src>

<mosaic_0001>
module attributes {stable_mosaic.version = 11 : i64} {
  func.func @_mm_kernel(%arg0: i32, %arg1: i32, %arg2: memref<512x128xbf16, #tpu.memory_space<vmem>>, %arg3: memref<128x128xbf16, #tpu.memory_space<vmem>>, %arg4: memref<1x128xf32, #tpu.memory_space<vmem>>, %arg5: memref<512x128xf32, #tpu.memory_space<vmem>>) attributes {dimension_semantics = [#tpu.dimension_semantics<parallel>, #tpu.dimension_semantics<parallel>], iteration_bounds = array<i64: 1, 1>, scalar_prefetch = 0 : i64, scratch_operands = 0 : i64, tpu.core_type = #tpu.core_type<tc>, window_params = [{transform_indices = @transform_0, window_bounds = array<i64: 512, 128>}, {transform_indices = @transform_1, window_bounds = array<i64: 128, 128>}, {transform_indices = @transform_2, window_bounds = array<i64: 1, 128>}, {transform_indices = @transform_3, window_bounds = array<i64: 512, 128>}]} {
    %c0 = arith.constant 0 : index
    %c0_0 = arith.constant 0 : index
    %0 = vector.load %arg2[%c0, %c0_0] : memref<512x128xbf16, #tpu.memory_space<vmem>>, vector<512x128xbf16>
    %c0_1 = arith.constant 0 : index
    %c0_2 = arith.constant 0 : index
    %1 = vector.load %arg3[%c0_1, %c0_2] : memref<128x128xbf16, #tpu.memory_space<vmem>>, vector<128x128xbf16>
    %cst = arith.constant dense<0.000000e+00> : vector<512x128xf32>
    %2 = tpu.matmul %0, %1, %cst {dimension_numbers = #tpu.dot_dimension_numbers<[1], [0], [0], [1], [0, 0, 1, 1], [], []>} : vector<512x128xbf16>, vector<128x128xbf16>, vector<512x128xf32> -> vector<512x128xf32>
    %c0_3 = arith.constant 0 : index
    %c0_4 = arith.constant 0 : index
    %3 = vector.load %arg4[%c0_3, %c0_4] : memref<1x128xf32, #tpu.memory_space<vmem>>, vector<1x128xf32>
    %4 = vector.broadcast %3 : vector<1x128xf32> to vector<512x128xf32>
    %5 = arith.addf %2, %4 : vector<512x128xf32>
    %cst_5 = arith.constant 0.000000e+00 : f32
    %6 = vector.broadcast %cst_5 : f32 to vector<512x128xf32>
    %7 = arith.maximumf %5, %6 : vector<512x128xf32>
    %c0_6 = arith.constant 0 : index
    %c0_7 = arith.constant 0 : index
    %8 = vector.load %arg5[%c0_6, %c0_7] : memref<512x128xf32, #tpu.memory_space<vmem>>, vector<512x128xf32>
    tpu.vector_store %arg5[%c0_6, %c0_7], %7 {strides = array<i32>} : memref<512x128xf32, #tpu.memory_space<vmem>>, vector<512x128xf32>,
    return
  }
  func.func @transform_0(%arg0: i32, %arg1: i32) -> (i32, i32) {
    %c0_i32 = arith.constant 0 : i32
    %c0_i32_0 = arith.constant 0 : i32
    return %arg0, %c0_i32 : i32, i32
  }
  func.func @transform_1(%arg0: i32, %arg1: i32) -> (i32, i32) {
    %c0_i32 = arith.constant 0 : i32
    %c0_i32_0 = arith.constant 0 : i32
    return %c0_i32, %arg1 : i32, i32
  }
  func.func @transform_2(%arg0: i32, %arg1: i32) -> (i32, i32) {
    %c0_i32 = arith.constant 0 : i32
    %c0_i32_0 = arith.constant 0 : i32
    return %c0_i32, %arg1 : i32, i32
  }
  func.func @transform_3(%arg0: i32, %arg1: i32) -> (i32, i32) {
    %c0_i32 = arith.constant 0 : i32
    return %arg0, %arg1 : i32, i32
  }
}

</mosaic_0001>

<bundles_post_ra>
// kernel: matmul_bias_act.1
= control target key start
LH: loop header
LB: loop body
LE: loop exit
PB: predicated region body
PF: predicated region fallthrough
CT: control target
= control target key end

     0   :  { %s1265_s1 = inlined_call_operand.vmem [shape: bf16[128,128], index: 1, kind: input, shape index: {}]   ;;  %s1266_s2 = inlined_call_operand.vmem [shape: f32[1,128], index: 2, kind: input, shape index: {}]   ;;  %s1267_s0 = inlined_call_operand.vmem [shape: bf16[512,128], index: 0, kind: input, shape index: {}]   ;;  %s1268_s3 = inlined_call_operand.vmem [shape: f32[512,128], index: 3, kind: output, shape index: {}]  }
   0x1   :  { %v838_v0 = vld [vmem:[%s1265_s1 + $0x38] sm:$0xff]  ;;  %v837_v1 = vld [vmem:[%s1265_s1 + $0x30] sm:$0xff]  ;;  %v836_v2 = vld [vmem:[%s1265_s1 + $0x28] sm:$0xff] }
   0x2   :  { %338 = vmatpush.bf16.msra.mxu0 %v838_v0  ;;  %839 = vmatpush.bf16.msra.mxu1 %v838_v0  ;;  %v835_v3 = vld [vmem:[%s1265_s1 + $0x20] sm:$0xff]  ;;  %v834_v4 = vld [vmem:[%s1265_s1 + $0x18] sm:$0xff]  ;;  %v833_v5 = vld [vmem:[%s1265_s1 + $0x10] sm:$0xff] }
   0x3   :  { %840 = vmatpush.bf16.msra.mxu2 %v838_v0  ;;  %841 = vmatpush.bf16.msra.mxu3 %v838_v0  ;;  %v832_v6 = vld [vmem:[%s1265_s1 + $0x8] sm:$0xff]  ;;  %v831_v7 = vld [vmem:[%s1265_s1] sm:$0xff]  ;;  %v801_v16 = vld [vmem:[%s1267_s0 + $0x10] sm:$0xff] }
   0x4   :  { %v799_v8 = vld [vmem:[%s1267_s0] sm:$0xff]  ;;  %v800_v12 = vld [vmem:[%s1267_s0 + $0x8] sm:$0xff]  ;;  %v809_v17 = vld [vmem:[%s1267_s0 + $0x50] sm:$0xff] }
   0x5   :  { %v807_v9 = vld [vmem:[%s1267_s0 + $0x40] sm:$0xff]  ;;  %v808_v13 = vld [vmem:[%s1267_s0 + $0x48] sm:$0xff]  ;;  %v817_v18 = vld [vmem:[%s1267_s0 + $0x90] sm:$0xff] }
   0x6   :  { %339 = vmatpush.bf16.msra.mxu0 %v837_v1  ;;  %842 = vmatpush.bf16.msra.mxu1 %v837_v1  ;;  %v815_v10 = vld [vmem:[%s1267_s0 + $0x80] sm:$0xff]  ;;  %v816_v14 = vld [vmem:[%s1267_s0 + $0x88] sm:$0xff]  ;;  %v825_v19 = vld [vmem:[%s1267_s0 + $0xd0] sm:$0xff] }
   0x7   :  { %843 = vmatpush.bf16.msra.mxu2 %v837_v1  ;;  %844 = vmatpush.bf16.msra.mxu3 %v837_v1  ;;  %v823_v11 = vld [vmem:[%s1267_s0 + $0xc0] sm:$0xff]  ;;  %v824_v15 = vld [vmem:[%s1267_s0 + $0xc8] sm:$0xff]  ;;  %v802_v20 = vld [vmem:[%s1267_s0 + $0x18] sm:$0xff] }
   0x8   :  { %v810_v21 = vld [vmem:[%s1267_s0 + $0x58] sm:$0xff]  ;;  %v803_v24 = vld [vmem:[%s1267_s0 + $0x20] sm:$0xff]  ;;  %v804_v28 = vld [vmem:[%s1267_s0 + $0x28] sm:$0xff] }
   0x9   :  { %v818_v22 = vld [vmem:[%s1267_s0 + $0x98] sm:$0xff]  ;;  %v811_v25 = vld [vmem:[%s1267_s0 + $0x60] sm:$0xff]  ;;  %v812_v29 = vld [vmem:[%s1267_s0 + $0x68] sm:$0xff] }
   0xa   :  { %340 = vmatpush.bf16.msra.mxu0 %v836_v2  ;;  %845 = vmatpush.bf16.msra.mxu1 %v836_v2  ;;  %v826_v23 = vld [vmem:[%s1267_s0 + $0xd8] sm:$0xff]  ;;  %v819_v26 = vld [vmem:[%s1267_s0 + $0xa0] sm:$0xff]  ;;  %v820_v30 = vld [vmem:[%s1267_s0 + $0xa8] sm:$0xff] }
   0xb   :  { %846 = vmatpush.bf16.msra.mxu2 %v836_v2  ;;  %847 = vmatpush.bf16.msra.mxu3 %v836_v2  ;;  %v827_v27 = vld [vmem:[%s1267_s0 + $0xe0] sm:$0xff]  ;;  %v828_v31 = vld [vmem:[%s1267_s0 + $0xe8] sm:$0xff]  ;;  %v805_v32 = vld [vmem:[%s1267_s0 + $0x30] sm:$0xff] }
   0xc   :  { %v813_v33 = vld [vmem:[%s1267_s0 + $0x70] sm:$0xff]  ;;  %v806_v36 = vld [vmem:[%s1267_s0 + $0x38] sm:$0xff]  ;;  %v1007_v40 = vld [vmem:[%s1266_s2] ss:$0 sm:$0xff] }
   0xd   :  { %v821_v34 = vld [vmem:[%s1267_s0 + $0xb0] sm:$0xff]  ;;  %v814_v37 = vld [vmem:[%s1267_s0 + $0x78] sm:$0xff] }
   0xe   :  { %341 = vmatpush.bf16.msra.mxu0 %v835_v3  ;;  %848 = vmatpush.bf16.msra.mxu1 %v835_v3  ;;  %v829_v35 = vld [vmem:[%s1267_s0 + $0xf0] sm:$0xff]  ;;  %v822_v38 = vld [vmem:[%s1267_s0 + $0xb8] sm:$0xff] }
   0xf   :  { %849 = vmatpush.bf16.msra.mxu2 %v835_v3  ;;  %850 = vmatpush.bf16.msra.mxu3 %v835_v3  ;;  %v830_v39 = vld [vmem:[%s1267_s0 + $0xf8] sm:$0xff] }
  0x12   :  { %342 = vmatpush.bf16.msra.mxu0 %v834_v4  ;;  %851 = vmatpush.bf16.msra.mxu1 %v834_v4 }
  0x13   :  { %852 = vmatpush.bf16.msra.mxu2 %v834_v4  ;;  %853 = vmatpush.bf16.msra.mxu3 %v834_v4 }
  0x16   :  { %343 = vmatpush.bf16.msra.mxu0 %v833_v5  ;;  %854 = vmatpush.bf16.msra.mxu1 %v833_v5 }
  0x17   :  { %855 = vmatpush.bf16.msra.mxu2 %v833_v5  ;;  %856 = vmatpush.bf16.msra.mxu3 %v833_v5 }
  0x1a   :  { %344 = vmatpush.bf16.msra.mxu0 %v832_v6  ;;  %857 = vmatpush.bf16.msra.mxu1 %v832_v6 }
  0x1b   :  { %858 = vmatpush.bf16.msra.mxu2 %v832_v6  ;;  %859 = vmatpush.bf16.msra.mxu3 %v832_v6 }
  0x1e   :  { %345 = vmatpush.bf16.msra.mxu0 %v831_v7  ;;  %860 = vmatpush.bf16.msra.mxu1 %v831_v7 }
  0x1f   :  { %861 = vmatpush.bf16.msra.mxu2 %v831_v7  ;;  %862 = vmatpush.bf16.msra.mxu3 %v831_v7 }
  0x21   :  { %346 = vmatmul.bf16.vlgmr.msra.gmra.mxu0 %v799_v8  ;;  %386 = vmatmul.bf16.vlgmr.msra.gmra.mxu1 %v807_v9 }
  0x22   :  { %426 = vmatmul.bf16.vlgmr.msra.gmra.mxu2 %v815_v10  ;;  %466 = vmatmul.bf16.vlgmr.msra.gmra.mxu3 %v823_v11 }
  0x31   :  { %351 = vmatmul.bf16.gmra.mxu0 %v800_v12  ;;  %391 = vmatmul.bf16.gmra.mxu1 %v808_v13 }
  0x32   :  { %431 = vmatmul.bf16.gmra.mxu2 %v816_v14  ;;  %471 = vmatmul.bf16.gmra.mxu3 %v824_v15 }
  0x41   :  { %356 = vmatmul.bf16.gmra.mxu0 %v801_v16  ;;  %396 = vmatmul.bf16.gmra.mxu1 %v809_v17 }
  0x42   :  { %436 = vmatmul.bf16.gmra.mxu2 %v817_v18  ;;  %476 = vmatmul.bf16.gmra.mxu3 %v825_v19 }
  0x51   :  { %361 = vmatmul.bf16.gmra.mxu0 %v802_v20  ;;  %401 = vmatmul.bf16.gmra.mxu1 %v810_v21 }
  0x52   :  { %441 = vmatmul.bf16.gmra.mxu2 %v818_v22  ;;  %481 = vmatmul.bf16.gmra.mxu3 %v826_v23 }
  0x61   :  { %366 = vmatmul.bf16.gmra.mxu0 %v803_v24  ;;  %406 = vmatmul.bf16.gmra.mxu1 %v811_v25 }
  0x62   :  { %446 = vmatmul.bf16.gmra.mxu2 %v819_v26  ;;  %486 = vmatmul.bf16.gmra.mxu3 %v827_v27 }
  0x71   :  { %371 = vmatmul.bf16.gmra.mxu0 %v804_v28  ;;  %411 = vmatmul.bf16.gmra.mxu1 %v812_v29 }
  0x72   :  { %451 = vmatmul.bf16.gmra.mxu2 %v820_v30  ;;  %491 = vmatmul.bf16.gmra.mxu3 %v828_v31 }
  0x81   :  { %376 = vmatmul.bf16.gmra.mxu0 %v805_v32  ;;  %416 = vmatmul.bf16.gmra.mxu1 %v813_v33 }
  0x82   :  { %456 = vmatmul.bf16.gmra.mxu2 %v821_v34  ;;  %496 = vmatmul.bf16.gmra.mxu3 %v829_v35 }
  0x91   :  { %381 = vmatmul.bf16.gmra.mxu0 %v806_v36  ;;  %421 = vmatmul.bf16.gmra.mxu1 %v814_v37 }
  0x92   :  { %461 = vmatmul.bf16.gmra.mxu2 %v822_v38  ;;  %501 = vmatmul.bf16.gmra.mxu3 %v830_v39 }
  0x9e   :  { %v347_v41 = vpop.f32.mrf.mxu0  ;;  %v387_v42 = vpop.f32.mrf.mxu1 }
  0x9f   :  { %v348_v43 = vadd.f32 %v1007_v40, %v347_v41  ;;  %v388_v44 = vadd.f32 %v1007_v40, %v387_v42 }
  0xa1   :  { %v507_v45 = vmax.f32 %v348_v43, 0.0  ;;  %v523_v46 = vmax.f32 %v388_v44, 0.0 }
  0xa3   :  { %571 = vst [vmem:[%s1268_s3] sm:$0xff] %v507_v45 }
  0xa4   :  { %587 = vst [vmem:[%s1268_s3 + $0x80] sm:$0xff] %v523_v46 }
  0xa5   :  { %v427_v47 = vpop.f32.mrf.mxu2  ;;  %v467_v48 = vpop.f32.mrf.mxu3 }
  0xa6   :  { %v428_v49 = vadd.f32 %v1007_v40, %v427_v47  ;;  %v468_v50 = vadd.f32 %v1007_v40, %v467_v48  ;;  %v349_v51 = vpop.f32.mrf.mxu0  ;;  %v389_v52 = vpop.f32.mrf.mxu1 }
  0xa7   :  { %v350_v53 = vadd.f32 %v1007_v40, %v349_v51  ;;  %v390_v54 = vadd.f32 %v1007_v40, %v389_v52 }
  0xa8   :  { %v539_v55 = vmax.f32 %v428_v49, 0.0  ;;  %v555_v56 = vmax.f32 %v468_v50, 0.0 }
  0xa9   :  { %v508_v57 = vmax.f32 %v350_v53, 0.0  ;;  %v524_v58 = vmax.f32 %v390_v54, 0.0 }
  0xaa   :  { %603 = vst [vmem:[%s1268_s3 + $0x100] sm:$0xff] %v539_v55 }
  0xab   :  { %619 = vst [vmem:[%s1268_s3 + $0x180] sm:$0xff] %v555_v56 }
  0xac   :  { %572 = vst [vmem:[%s1268_s3 + $0x8] sm:$0xff] %v508_v57 }
  0xad   :  { %588 = vst [vmem:[%s1268_s3 + $0x88] sm:$0xff] %v524_v58  ;;  %v429_v59 = vpop.f32.mrf.mxu2  ;;  %v469_v60 = vpop.f32.mrf.mxu3 }
  0xae   :  { %v430_v61 = vadd.f32 %v1007_v40, %v429_v59  ;;  %v470_v62 = vadd.f32 %v1007_v40, %v469_v60  ;;  %v352_v63 = vpop.f32.mrf.mxu0  ;;  %v392_v0 = vpop.f32.mrf.mxu1 }
  0xaf   :  { %v353_v1 = vadd.f32 %v1007_v40, %v352_v63  ;;  %v393_v2 = vadd.f32 %v1007_v40, %v392_v0 }
  0xb0   :  { %v540_v3 = vmax.f32 %v430_v61, 0.0  ;;  %v556_v4 = vmax.f32 %v470_v62, 0.0 }
  0xb1   :  { %v509_v5 = vmax.f32 %v353_v1, 0.0  ;;  %v525_v6 = vmax.f32 %v393_v2, 0.0 }
  0xb2   :  { %604 = vst [vmem:[%s1268_s3 + $0x108] sm:$0xff] %v540_v3 }
  0xb3   :  { %620 = vst [vmem:[%s1268_s3 + $0x188] sm:$0xff] %v556_v4 }
  0xb4   :  { %573 = vst [vmem:[%s1268_s3 + $0x10] sm:$0xff] %v509_v5 }
  0xb5   :  { %589 = vst [vmem:[%s1268_s3 + $0x90] sm:$0xff] %v525_v6  ;;  %v432_v7 = vpop.f32.mrf.mxu2  ;;  %v472_v8 = vpop.f32.mrf.mxu3 }
  0xb6   :  { %v433_v9 = vadd.f32 %v1007_v40, %v432_v7  ;;  %v473_v10 = vadd.f32 %v1007_v40, %v472_v8  ;;  %v354_v11 = vpop.f32.mrf.mxu0  ;;  %v394_v12 = vpop.f32.mrf.mxu1 }
  0xb7   :  { %v355_v13 = vadd.f32 %v1007_v40, %v354_v11  ;;  %v395_v14 = vadd.f32 %v1007_v40, %v394_v12 }
  0xb8   :  { %v541_v15 = vmax.f32 %v433_v9, 0.0  ;;  %v557_v16 = vmax.f32 %v473_v10, 0.0 }
  0xb9   :  { %v510_v17 = vmax.f32 %v355_v13, 0.0  ;;  %v526_v18 = vmax.f32 %v395_v14, 0.0 }
  0xba   :  { %605 = vst [vmem:[%s1268_s3 + $0x110] sm:$0xff] %v541_v15 }
  0xbb   :  { %621 = vst [vmem:[%s1268_s3 + $0x190] sm:$0xff] %v557_v16 }
  0xbc   :  { %574 = vst [vmem:[%s1268_s3 + $0x18] sm:$0xff] %v510_v17 }
  0xbd   :  { %590 = vst [vmem:[%s1268_s3 + $0x98] sm:$0xff] %v526_v18  ;;  %v434_v19 = vpop.f32.mrf.mxu2  ;;  %v474_v20 = vpop.f32.mrf.mxu3 }
  0xbe   :  { %v435_v21 = vadd.f32 %v1007_v40, %v434_v19  ;;  %v475_v22 = vadd.f32 %v1007_v40, %v474_v20  ;;  %v357_v23 = vpop.f32.mrf.mxu0  ;;  %v397_v24 = vpop.f32.mrf.mxu1 }
  0xbf   :  { %v358_v25 = vadd.f32 %v1007_v40, %v357_v23  ;;  %v398_v26 = vadd.f32 %v1007_v40, %v397_v24 }
  0xc0   :  { %v542_v27 = vmax.f32 %v435_v21, 0.0  ;;  %v558_v28 = vmax.f32 %v475_v22, 0.0 }
  0xc1   :  { %v511_v29 = vmax.f32 %v358_v25, 0.0  ;;  %v527_v30 = vmax.f32 %v398_v26, 0.0 }
  0xc2   :  { %606 = vst [vmem:[%s1268_s3 + $0x118] sm:$0xff] %v542_v27 }
  0xc3   :  { %622 = vst [vmem:[%s1268_s3 + $0x198] sm:$0xff] %v558_v28 }
  0xc4   :  { %575 = vst [vmem:[%s1268_s3 + $0x20] sm:$0xff] %v511_v29 }
  0xc5   :  { %591 = vst [vmem:[%s1268_s3 + $0xa0] sm:$0xff] %v527_v30  ;;  %v437_v31 = vpop.f32.mrf.mxu2  ;;  %v477_v32 = vpop.f32.mrf.mxu3 }
  0xc6   :  { %v438_v33 = vadd.f32 %v1007_v40, %v437_v31  ;;  %v478_v34 = vadd.f32 %v1007_v40, %v477_v32  ;;  %v359_v35 = vpop.f32.mrf.mxu0  ;;  %v399_v36 = vpop.f32.mrf.mxu1 }
  0xc7   :  { %v360_v37 = vadd.f32 %v1007_v40, %v359_v35  ;;  %v400_v38 = vadd.f32 %v1007_v40, %v399_v36 }
  0xc8   :  { %v543_v39 = vmax.f32 %v438_v33, 0.0  ;;  %v559_v41 = vmax.f32 %v478_v34, 0.0 }
  0xc9   :  { %v512_v42 = vmax.f32 %v360_v37, 0.0  ;;  %v528_v43 = vmax.f32 %v400_v38, 0.0 }
  0xca   :  { %607 = vst [vmem:[%s1268_s3 + $0x120] sm:$0xff] %v543_v39 }
  0xcb   :  { %623 = vst [vmem:[%s1268_s3 + $0x1a0] sm:$0xff] %v559_v41 }
  0xcc   :  { %576 = vst [vmem:[%s1268_s3 + $0x28] sm:$0xff] %v512_v42 }
  0xcd   :  { %592 = vst [vmem:[%s1268_s3 + $0xa8] sm:$0xff] %v528_v43  ;;  %v439_v44 = vpop.f32.mrf.mxu2  ;;  %v479_v45 = vpop.f32.mrf.mxu3 }
  0xce   :  { %v440_v46 = vadd.f32 %v1007_v40, %v439_v44  ;;  %v480_v47 = vadd.f32 %v1007_v40, %v479_v45  ;;  %v362_v48 = vpop.f32.mrf.mxu0  ;;  %v402_v49 = vpop.f32.mrf.mxu1 }
  0xcf   :  { %v363_v50 = vadd.f32 %v1007_v40, %v362_v48  ;;  %v403_v51 = vadd.f32 %v1007_v40, %v402_v49 }
  0xd0   :  { %v544_v52 = vmax.f32 %v440_v46, 0.0  ;;  %v560_v53 = vmax.f32 %v480_v47, 0.0 }
  0xd1   :  { %v513_v54 = vmax.f32 %v363_v50, 0.0  ;;  %v529_v55 = vmax.f32 %v403_v51, 0.0 }
  0xd2   :  { %608 = vst [vmem:[%s1268_s3 + $0x128] sm:$0xff] %v544_v52 }
  0xd3   :  { %624 = vst [vmem:[%s1268_s3 + $0x1a8] sm:$0xff] %v560_v53 }
  0xd4   :  { %577 = vst [vmem:[%s1268_s3 + $0x30] sm:$0xff] %v513_v54 }
  0xd5   :  { %593 = vst [vmem:[%s1268_s3 + $0xb0] sm:$0xff] %v529_v55  ;;  %v442_v56 = vpop.f32.mrf.mxu2  ;;  %v482_v57 = vpop.f32.mrf.mxu3 }
  0xd6   :  { %v443_v58 = vadd.f32 %v1007_v40, %v442_v56  ;;  %v483_v59 = vadd.f32 %v1007_v40, %v482_v57  ;;  %v364_v60 = vpop.f32.mrf.mxu0  ;;  %v404_v61 = vpop.f32.mrf.mxu1 }
  0xd7   :  { %v365_v62 = vadd.f32 %v1007_v40, %v364_v60  ;;  %v405_v63 = vadd.f32 %v1007_v40, %v404_v61 }
  0xd8   :  { %v545_v0 = vmax.f32 %v443_v58, 0.0  ;;  %v561_v1 = vmax.f32 %v483_v59, 0.0 }
  0xd9   :  { %v514_v2 = vmax.f32 %v365_v62, 0.0  ;;  %v530_v3 = vmax.f32 %v405_v63, 0.0 }
  0xda   :  { %609 = vst [vmem:[%s1268_s3 + $0x130] sm:$0xff] %v545_v0 }
  0xdb   :  { %625 = vst [vmem:[%s1268_s3 + $0x1b0] sm:$0xff] %v561_v1 }
  0xdc   :  { %578 = vst [vmem:[%s1268_s3 + $0x38] sm:$0xff] %v514_v2 }
  0xdd   :  { %594 = vst [vmem:[%s1268_s3 + $0xb8] sm:$0xff] %v530_v3  ;;  %v444_v4 = vpop.f32.mrf.mxu2  ;;  %v484_v5 = vpop.f32.mrf.mxu3 }
  0xde   :  { %v445_v6 = vadd.f32 %v1007_v40, %v444_v4  ;;  %v485_v7 = vadd.f32 %v1007_v40, %v484_v5  ;;  %v367_v8 = vpop.f32.mrf.mxu0  ;;  %v407_v9 = vpop.f32.mrf.mxu1 }
  0xdf   :  { %v368_v10 = vadd.f32 %v1007_v40, %v367_v8  ;;  %v408_v11 = vadd.f32 %v1007_v40, %v407_v9 }
  0xe0   :  { %v546_v12 = vmax.f32 %v445_v6, 0.0  ;;  %v562_v13 = vmax.f32 %v485_v7, 0.0 }
  0xe1   :  { %v515_v14 = vmax.f32 %v368_v10, 0.0  ;;  %v531_v15 = vmax.f32 %v408_v11, 0.0 }
  0xe2   :  { %610 = vst [vmem:[%s1268_s3 + $0x138] sm:$0xff] %v546_v12 }
  0xe3   :  { %626 = vst [vmem:[%s1268_s3 + $0x1b8] sm:$0xff] %v562_v13 }
  0xe4   :  { %579 = vst [vmem:[%s1268_s3 + $0x40] sm:$0xff] %v515_v14 }
  0xe5   :  { %595 = vst [vmem:[%s1268_s3 + $0xc0] sm:$0xff] %v531_v15  ;;  %v447_v16 = vpop.f32.mrf.mxu2  ;;  %v487_v17 = vpop.f32.mrf.mxu3 }
  0xe6   :  { %v448_v18 = vadd.f32 %v1007_v40, %v447_v16  ;;  %v488_v19 = vadd.f32 %v1007_v40, %v487_v17  ;;  %v369_v20 = vpop.f32.mrf.mxu0  ;;  %v409_v21 = vpop.f32.mrf.mxu1 }
  0xe7   :  { %v370_v22 = vadd.f32 %v1007_v40, %v369_v20  ;;  %v410_v23 = vadd.f32 %v1007_v40, %v409_v21 }
  0xe8   :  { %v547_v24 = vmax.f32 %v448_v18, 0.0  ;;  %v563_v25 = vmax.f32 %v488_v19, 0.0 }
  0xe9   :  { %v516_v26 = vmax.f32 %v370_v22, 0.0  ;;  %v532_v27 = vmax.f32 %v410_v23, 0.0 }
  0xea   :  { %611 = vst [vmem:[%s1268_s3 + $0x140] sm:$0xff] %v547_v24 }
  0xeb   :  { %627 = vst [vmem:[%s1268_s3 + $0x1c0] sm:$0xff] %v563_v25 }
  0xec   :  { %580 = vst [vmem:[%s1268_s3 + $0x48] sm:$0xff] %v516_v26 }
  0xed   :  { %596 = vst [vmem:[%s1268_s3 + $0xc8] sm:$0xff] %v532_v27  ;;  %v449_v28 = vpop.f32.mrf.mxu2  ;;  %v489_v29 = vpop.f32.mrf.mxu3 }
  0xee   :  { %v450_v30 = vadd.f32 %v1007_v40, %v449_v28  ;;  %v490_v31 = vadd.f32 %v1007_v40, %v489_v29  ;;  %v372_v32 = vpop.f32.mrf.mxu0  ;;  %v412_v33 = vpop.f32.mrf.mxu1 }
  0xef   :  { %v373_v34 = vadd.f32 %v1007_v40, %v372_v32  ;;  %v413_v35 = vadd.f32 %v1007_v40, %v412_v33 }
  0xf0   :  { %v548_v36 = vmax.f32 %v450_v30, 0.0  ;;  %v564_v37 = vmax.f32 %v490_v31, 0.0 }
  0xf1   :  { %v517_v38 = vmax.f32 %v373_v34, 0.0  ;;  %v533_v39 = vmax.f32 %v413_v35, 0.0 }
  0xf2   :  { %612 = vst [vmem:[%s1268_s3 + $0x148] sm:$0xff] %v548_v36 }
  0xf3   :  { %628 = vst [vmem:[%s1268_s3 + $0x1c8] sm:$0xff] %v564_v37 }
  0xf4   :  { %581 = vst [vmem:[%s1268_s3 + $0x50] sm:$0xff] %v517_v38 }
  0xf5   :  { %597 = vst [vmem:[%s1268_s3 + $0xd0] sm:$0xff] %v533_v39  ;;  %v452_v41 = vpop.f32.mrf.mxu2  ;;  %v492_v42 = vpop.f32.mrf.mxu3 }
  0xf6   :  { %v453_v43 = vadd.f32 %v1007_v40, %v452_v41  ;;  %v493_v44 = vadd.f32 %v1007_v40, %v492_v42  ;;  %v374_v45 = vpop.f32.mrf.mxu0  ;;  %v414_v46 = vpop.f32.mrf.mxu1 }
  0xf7   :  { %v375_v47 = vadd.f32 %v1007_v40, %v374_v45  ;;  %v415_v48 = vadd.f32 %v1007_v40, %v414_v46 }
  0xf8   :  { %v549_v49 = vmax.f32 %v453_v43, 0.0  ;;  %v565_v50 = vmax.f32 %v493_v44, 0.0 }
  0xf9   :  { %v518_v51 = vmax.f32 %v375_v47, 0.0  ;;  %v534_v52 = vmax.f32 %v415_v48, 0.0 }
  0xfa   :  { %613 = vst [vmem:[%s1268_s3 + $0x150] sm:$0xff] %v549_v49 }
  0xfb   :  { %629 = vst [vmem:[%s1268_s3 + $0x1d0] sm:$0xff] %v565_v50 }
  0xfc   :  { %582 = vst [vmem:[%s1268_s3 + $0x58] sm:$0xff] %v518_v51 }
  0xfd   :  { %598 = vst [vmem:[%s1268_s3 + $0xd8] sm:$0xff] %v534_v52  ;;  %v454_v53 = vpop.f32.mrf.mxu2  ;;  %v494_v54 = vpop.f32.mrf.mxu3 }
  0xfe   :  { %v455_v55 = vadd.f32 %v1007_v40, %v454_v53  ;;  %v495_v56 = vadd.f32 %v1007_v40, %v494_v54  ;;  %v377_v57 = vpop.f32.mrf.mxu0  ;;  %v417_v58 = vpop.f32.mrf.mxu1 }
  0xff   :  { %v378_v59 = vadd.f32 %v1007_v40, %v377_v57  ;;  %v418_v60 = vadd.f32 %v1007_v40, %v417_v58 }
 0x100   :  { %v550_v61 = vmax.f32 %v455_v55, 0.0  ;;  %v566_v62 = vmax.f32 %v495_v56, 0.0 }
 0x101   :  { %v519_v63 = vmax.f32 %v378_v59, 0.0  ;;  %v535_v0 = vmax.f32 %v418_v60, 0.0 }
 0x102   :  { %614 = vst [vmem:[%s1268_s3 + $0x158] sm:$0xff] %v550_v61 }
 0x103   :  { %630 = vst [vmem:[%s1268_s3 + $0x1d8] sm:$0xff] %v566_v62 }
 0x104   :  { %583 = vst [vmem:[%s1268_s3 + $0x60] sm:$0xff] %v519_v63 }
 0x105   :  { %599 = vst [vmem:[%s1268_s3 + $0xe0] sm:$0xff] %v535_v0  ;;  %v457_v1 = vpop.f32.mrf.mxu2  ;;  %v497_v2 = vpop.f32.mrf.mxu3 }
 0x106   :  { %v458_v3 = vadd.f32 %v1007_v40, %v457_v1  ;;  %v498_v4 = vadd.f32 %v1007_v40, %v497_v2  ;;  %v379_v5 = vpop.f32.mrf.mxu0  ;;  %v419_v6 = vpop.f32.mrf.mxu1 }
 0x107   :  { %v380_v7 = vadd.f32 %v1007_v40, %v379_v5  ;;  %v420_v8 = vadd.f32 %v1007_v40, %v419_v6 }
 0x108   :  { %v551_v9 = vmax.f32 %v458_v3, 0.0  ;;  %v567_v10 = vmax.f32 %v498_v4, 0.0 }
 0x109   :  { %v520_v11 = vmax.f32 %v380_v7, 0.0  ;;  %v536_v12 = vmax.f32 %v420_v8, 0.0 }
 0x10a   :  { %615 = vst [vmem:[%s1268_s3 + $0x160] sm:$0xff] %v551_v9 }
 0x10b   :  { %631 = vst [vmem:[%s1268_s3 + $0x1e0] sm:$0xff] %v567_v10 }
 0x10c   :  { %584 = vst [vmem:[%s1268_s3 + $0x68] sm:$0xff] %v520_v11 }
 0x10d   :  { %600 = vst [vmem:[%s1268_s3 + $0xe8] sm:$0xff] %v536_v12  ;;  %v459_v13 = vpop.f32.mrf.mxu2  ;;  %v499_v14 = vpop.f32.mrf.mxu3 }
 0x10e   :  { %v460_v15 = vadd.f32 %v1007_v40, %v459_v13  ;;  %v500_v16 = vadd.f32 %v1007_v40, %v499_v14  ;;  %v382_v17 = vpop.f32.mrf.mxu0  ;;  %v422_v18 = vpop.f32.mrf.mxu1 }
 0x10f   :  { %v383_v19 = vadd.f32 %v1007_v40, %v382_v17  ;;  %v423_v20 = vadd.f32 %v1007_v40, %v422_v18 }
 0x110   :  { %v552_v21 = vmax.f32 %v460_v15, 0.0  ;;  %v568_v22 = vmax.f32 %v500_v16, 0.0 }
 0x111   :  { %v521_v23 = vmax.f32 %v383_v19, 0.0  ;;  %v537_v24 = vmax.f32 %v423_v20, 0.0 }
 0x112   :  { %616 = vst [vmem:[%s1268_s3 + $0x168] sm:$0xff] %v552_v21 }
 0x113   :  { %632 = vst [vmem:[%s1268_s3 + $0x1e8] sm:$0xff] %v568_v22 }
 0x114   :  { %585 = vst [vmem:[%s1268_s3 + $0x70] sm:$0xff] %v521_v23 }
 0x115   :  { %601 = vst [vmem:[%s1268_s3 + $0xf0] sm:$0xff] %v537_v24  ;;  %v462_v25 = vpop.f32.mrf.mxu2  ;;  %v502_v26 = vpop.f32.mrf.mxu3 }
 0x116   :  { %v463_v27 = vadd.f32 %v1007_v40, %v462_v25  ;;  %v503_v28 = vadd.f32 %v1007_v40, %v502_v26  ;;  %v384_v29 = vpop.f32.mrf.mxu0  ;;  %v424_v30 = vpop.f32.mrf.mxu1 }
 0x117   :  { %v385_v31 = vadd.f32 %v1007_v40, %v384_v29  ;;  %v425_v32 = vadd.f32 %v1007_v40, %v424_v30 }
 0x118   :  { %v553_v33 = vmax.f32 %v463_v27, 0.0  ;;  %v569_v34 = vmax.f32 %v503_v28, 0.0 }
 0x119   :  { %v522_v35 = vmax.f32 %v385_v31, 0.0  ;;  %v538_v36 = vmax.f32 %v425_v32, 0.0 }
 0x11a   :  { %617 = vst [vmem:[%s1268_s3 + $0x170] sm:$0xff] %v553_v33 }
 0x11b   :  { %633 = vst [vmem:[%s1268_s3 + $0x1f0] sm:$0xff] %v569_v34 }
 0x11c   :  { %586 = vst [vmem:[%s1268_s3 + $0x78] sm:$0xff] %v522_v35 }
 0x11d   :  { %602 = vst [vmem:[%s1268_s3 + $0xf8] sm:$0xff] %v538_v36  ;;  %v464_v37 = vpop.f32.mrf.mxu2  ;;  %v504_v38 = vpop.f32.mrf.mxu3 }
 0x11e   :  { %v465_v39 = vadd.f32 %v1007_v40, %v464_v37  ;;  %v505_v41 = vadd.f32 %v1007_v40, %v504_v38 }
 0x120   :  { %v554_v42 = vmax.f32 %v465_v39, 0.0  ;;  %v570_v43 = vmax.f32 %v505_v41, 0.0 }
 0x122   :  { %618 = vst [vmem:[%s1268_s3 + $0x178] sm:$0xff] %v554_v42 }
 0x123   :  { %634 = vst [vmem:[%s1268_s3 + $0x1f8] sm:$0xff] %v570_v43 }

</bundles_post_ra>
